<compile_context>
chip_gen: v5e
topology: v5e:2x2
jax: 0.10.0
libtpu: 0.0.40
codegen_flags: <defaults>
</compile_context>

<pallas_src>
import jax
import jax.numpy as jnp
from jax.experimental import pallas as pl
from jax.experimental.pallas import tpu as pltpu


def _gelu_tanh(x):
    # 0.5*x*(1+tanh(sqrt(2/pi)*(x+0.044715*x^3))) -- exact match of the module.
    c = jnp.sqrt(2.0 / jnp.pi).astype(x.dtype)
    return 0.5 * x * (1.0 + jnp.tanh(c * (x + 0.044715 * (x * x * x))))


def _ffn_kernel(x_ref, w1_ref, b1_ref, w2_ref, b2_ref, o_ref, acc_ref):
    # x_ref: (tm, E)    w1_ref: (E, th)   b1_ref: (1, H_pad)
    # w2_ref: (th, E)   b2_ref: (1, E)    o_ref: (tm, E)   acc_ref: (tm, E) f32
    k = pl.program_id(1)
    th = w1_ref.shape[1]

    x = x_ref[...]
    # First matmul: operands stay in the matmul dtype (bf16 -> full MXU rate),
    # accumulation in f32.
    h = jnp.dot(x, w1_ref[...], preferred_element_type=jnp.float32)
    # b1 is resident as one full block; slice the current hidden window.
    b1_slice = b1_ref[:, pl.ds(pl.multiple_of(k * th, th), th)]
    h = h + b1_slice.astype(jnp.float32)
    h = _gelu_tanh(h)
    # Second matmul at native MXU rate; running sum stays f32 in VMEM scratch.
    partial = jnp.dot(
        h.astype(x.dtype), w2_ref[...], preferred_element_type=jnp.float32
    )

    # Fused init: first hidden slice writes the accumulator directly (saves one
    # full (tm, E) f32 read+write and a VPU add per row tile).
    @pl.when(k == 0)
    def _init():
        acc_ref[...] = partial

    @pl.when(k > 0)
    def _accum():
        acc_ref[...] += partial

    # Bias b2 is added exactly once, on the last hidden-dim step.
    @pl.when(k == pl.num_programs(1) - 1)
    def _finalize():
        o_ref[...] = (acc_ref[...] + b2_ref[...].astype(jnp.float32)).astype(
            o_ref.dtype
        )


def _round_up(a, b):
    return (a + b - 1) // b * b


def _device_kind():
    try:
        return jax.devices()[0].device_kind.lower()
    except Exception:
        return ""


def _vmem_capacity_bytes():
    try:
        cap = int(pltpu.get_tpu_info().vmem_capacity_bytes)
        if cap > 0:
            return cap
    except Exception:
        pass
    # Fall back on device_kind: v7x has 64 MiB/TC, earlier gens 128 MiB.
    return 64 * 1024 * 1024 if "v7" in _device_kind() else 128 * 1024 * 1024


def feedforward_pallas(x, w1, b1, w2, b2, *, tm=None, th=None, matmul_dtype=None):
    """x: [B, T, E]; w1: [E, 4E]; b1: [4E]; w2: [4E, E]; b2: [E]."""
    B, T, E = x.shape
    H = w1.shape[1]
    M = B * T

    out_dtype = x.dtype
    op_dtype = jnp.dtype(matmul_dtype) if matmul_dtype is not None else jnp.dtype(x.dtype)
    op_itemsize = op_dtype.itemsize
    out_itemsize = jnp.dtype(out_dtype).itemsize

    # ---- hardware-aware defaults --------------------------------------------
    kind = _device_kind()
    is_v7x = "v7" in kind
    is_v5e = ("v5 lite" in kind) or ("v5e" in kind) or ("v5litepod" in kind)
    is_v6e = "v6" in kind

    if tm is None:
        if is_v7x:
            tm = 512            # ~41 MiB working set at E=4096 bf16; MXU-bound per TC
        elif is_v6e:
            tm = 1024           # push intensity past the ~680 FLOP/byte v6e roofline
        elif is_v5e:
            tm = 256            # roofline-balanced at 197 TF/s / 0.82 TB/s
        else:
            tm = 512
    if th is None:
        th = 1024 if is_v5e else 512

    vmem_cap = _vmem_capacity_bytes()
    if vmem_cap <= 64 * 1024 * 1024:          # v7x-class part
        budget = int(0.75 * vmem_cap)          # ~48 MiB
        limit_cap = min(vmem_cap - 8 * 1024 * 1024, 56 * 1024 * 1024)
    else:                                      # 128 MiB parts (v5e/v6e)
        budget = int(0.72 * vmem_cap)          # ~92 MiB
        limit_cap = int(0.85 * vmem_cap)

    # ---- tile-size selection -------------------------------------------------
    # Row tile: multiple of 8, no larger than the (padded) row count.
    tm = min(tm, _round_up(M, 8))
    tm = max(8, _round_up(tm, 8))
    # Hidden tile: multiple of 128 (lane-dense MXU passes); pad H if needed.
    th = min(th, _round_up(H, 128))
    th = max(128, (th // 128) * 128)

    def vmem_estimate(tm_, th_):
        h_pad_ = _round_up(H, th_)
        # double-buffered input tiles (x, W1 slice, W2 slice, b1 full, b2)
        in_tiles = 2 * (tm_ * E + E * th_ + th_ * E + h_pad_ + E) * op_itemsize
        out_tile = 2 * tm_ * E * out_itemsize            # double-buffered output
        acc = tm_ * E * 4                                 # f32 accumulator scratch
        interm = tm_ * th_ * (4 + op_itemsize)            # f32 h + its cast copy
        scratch = 2 * 1024 * 1024                         # compiler internal slack
        return in_tiles + out_tile + acc + interm + scratch

    # Shrink th first (does not hurt weight-streaming intensity), then tm.
    while (
        vmem_estimate(tm, th) > budget
        and th > 256
        and (th // 2) % 128 == 0
    ):
        th //= 2
    while vmem_estimate(tm, th) > budget and tm > 256:
        tm = max(256, _round_up(tm // 2, 8))
    while (
        vmem_estimate(tm, th) > budget
        and th > 128
        and (th // 2) % 128 == 0
    ):
        th //= 2
    while vmem_estimate(tm, th) > budget and tm > 8:
        tm = max(8, _round_up(tm // 2, 8))

    H_pad = _round_up(H, th)
    M_pad = _round_up(M, tm)

    # ---- pad inputs to tile boundaries (zero pads contribute exactly 0) ------
    x2d = x.reshape(M, E).astype(op_dtype)
    if M_pad != M:
        x2d = jnp.pad(x2d, ((0, M_pad - M), (0, 0)))

    w1p = w1.astype(op_dtype)
    w2p = w2.astype(op_dtype)
    b1p = b1
    if H_pad != H:
        w1p = jnp.pad(w1p, ((0, 0), (0, H_pad - H)))
        w2p = jnp.pad(w2p, ((0, H_pad - H), (0, 0)))
        b1p = jnp.pad(b1p, ((0, H_pad - H),))
    b1_2d = b1p.reshape(1, H_pad)
    b2_2d = b2.reshape(1, E)

    grid = (M_pad // tm, H_pad // th)  # rows parallel (outer), hidden reduction (inner)

    # ---- cost estimate: weights are re-streamed once per row tile ------------
    n_row_tiles = M_pad // tm
    itemsize = op_itemsize
    cost = pl.CostEstimate(
        flops=4 * M_pad * E * H_pad,       # two matmuls: 2*M*E*H each
        transcendentals=M_pad * H_pad,     # one tanh per hidden element
        bytes_accessed=(
            x2d.size * itemsize
            + n_row_tiles * (w1p.size + w2p.size) * itemsize
            + (b1p.size + b2.size) * itemsize
            + M_pad * E * out_itemsize
        ),
    )

    vmem_limit = int(
        min(limit_cap, max(32 * 1024 * 1024, int(1.25 * vmem_estimate(tm, th))))
    )

    out2d = pl.pallas_call(
        _ffn_kernel,
        out_shape=jax.ShapeDtypeStruct((M_pad, E), out_dtype),
        grid_spec=pltpu.PrefetchScalarGridSpec(
            num_scalar_prefetch=0,
            grid=grid,
            in_specs=[
                pl.BlockSpec((tm, E), lambda i, k: (i, 0)),      # x row tile
                pl.BlockSpec((E, th), lambda i, k: (0, k)),      # W1 hidden slice
                pl.BlockSpec((1, H_pad), lambda i, k: (0, 0)),   # b1 (full, resident)
                pl.BlockSpec((th, E), lambda i, k: (k, 0)),      # W2 hidden slice
                pl.BlockSpec((1, E), lambda i, k: (0, 0)),       # b2
            ],
            out_specs=pl.BlockSpec((tm, E), lambda i, k: (i, 0)),
            scratch_shapes=[pltpu.VMEM((tm, E), jnp.float32)],
        ),
        compiler_params=pltpu.CompilerParams(
            dimension_semantics=("parallel", "arbitrary"),
            vmem_limit_bytes=vmem_limit,
        ),
        cost_estimate=cost,
    )(x2d, w1p, b1_2d, w2p, b2_2d)

    return out2d[:M].reshape(B, T, E)


def feedforward_ref(x, w1, b1, w2, b2):
    h = jnp.dot(x, w1) + b1
    h = _gelu_tanh(h)
    return jnp.dot(h, w2) + b2


if __name__ == "__main__":
    # Small config consistent with the module: cfg = {'emb_dim': 32}
    B, T, E = 2, 8, 32
    H = 4 * E

    key = jax.random.PRNGKey(0)
    kx, kw1, kb1, kw2, kb2 = jax.random.split(key, 5)

    x = jax.random.normal(kx, (B, T, E), dtype=jnp.float32)
    # torch Linear stores weight as [out, in]; we keep [in, out] so the kernel
    # does x @ W directly.
    w1 = jax.random.normal(kw1, (E, H), dtype=jnp.float32) * 0.02
    b1 = jax.random.normal(kb1, (H,), dtype=jnp.float32) * 0.02
    w2 = jax.random.normal(kw2, (H, E), dtype=jnp.float32) * 0.02
    b2 = jax.random.normal(kb2, (E,), dtype=jnp.float32) * 0.02

    out = feedforward_pallas(x, w1, b1, w2, b2)
    out = jax.block_until_ready(out)

    ref = feedforward_ref(x, w1, b1, w2, b2)
    assert out.shape == (B, T, E)
    assert jnp.allclose(out, ref, atol=1e-5, rtol=1e-5), "mismatch vs reference"

    print("KERNEL_OK")
</pallas_src>

<mosaic_0001>
module attributes {stable_mosaic.version = 11 : i64} {
  func.func @_ffn_kernel(%arg0: i32, %arg1: i32, %arg2: memref<16x32xf32, #tpu.memory_space<vmem>>, %arg3: memref<32x128xf32, #tpu.memory_space<vmem>>, %arg4: memref<1x128xf32, #tpu.memory_space<vmem>>, %arg5: memref<128x32xf32, #tpu.memory_space<vmem>>, %arg6: memref<1x32xf32, #tpu.memory_space<vmem>>, %arg7: memref<16x32xf32, #tpu.memory_space<vmem>>, %arg8: memref<16x32xf32, #tpu.memory_space<vmem>>) attributes {dimension_semantics = [#tpu.dimension_semantics<parallel>, #tpu.dimension_semantics<arbitrary>], iteration_bounds = array<i64: 1, 1>, scalar_prefetch = 0 : i64, scratch_operands = 1 : i64, tpu.core_type = #tpu.core_type<tc>, window_params = [{transform_indices = @transform_0, window_bounds = array<i64: 16, 32>}, {transform_indices = @transform_1, window_bounds = array<i64: 32, 128>}, {pipeline_mode = #tpu.pipeline_mode<synchronous>, transform_indices = @transform_2, window_bounds = array<i64: 1, 128>}, {transform_indices = @transform_3, window_bounds = array<i64: 128, 32>}, {pipeline_mode = #tpu.pipeline_mode<synchronous>, transform_indices = @transform_4, window_bounds = array<i64: 1, 32>}, {transform_indices = @transform_5, window_bounds = array<i64: 16, 32>}]} {
    %c0 = arith.constant 0 : index
    %c0_0 = arith.constant 0 : index
    %0 = vector.load %arg2[%c0, %c0_0] : memref<16x32xf32, #tpu.memory_space<vmem>>, vector<16x32xf32>
    %c0_1 = arith.constant 0 : index
    %c0_2 = arith.constant 0 : index
    %1 = vector.load %arg3[%c0_1, %c0_2] : memref<32x128xf32, #tpu.memory_space<vmem>>, vector<32x128xf32>
    %cst = arith.constant dense<0.000000e+00> : vector<16x128xf32>
    %2 = tpu.matmul %0, %1, %cst {dimension_numbers = #tpu.dot_dimension_numbers<[1], [0], [0], [1], [0, 0, 1, 1], [], []>} : vector<16x32xf32>, vector<32x128xf32>, vector<16x128xf32> -> vector<16x128xf32>
    %c128_i32 = arith.constant 128 : i32
    %3 = arith.muli %arg1, %c128_i32 : i32
    %4 = tpu.assume_multiple %3, 128 : i32
    %c0_3 = arith.constant 0 : index
    %5 = arith.index_cast %4 : i32 to index
    %6 = vector.load %arg4[%c0_3, %5] : memref<1x128xf32, #tpu.memory_space<vmem>>, vector<1x128xf32>
    %7 = vector.broadcast %6 : vector<1x128xf32> to vector<16x128xf32>
    %8 = arith.addf %2, %7 : vector<16x128xf32>
    %cst_4 = arith.constant 0.636619746 : f32
    %9 = math.sqrt %cst_4 : f32
    %cst_5 = arith.constant 5.000000e-01 : f32
    %10 = vector.broadcast %cst_5 : f32 to vector<16x128xf32>
    %11 = arith.mulf %10, %8 : vector<16x128xf32>
    %12 = arith.mulf %8, %8 : vector<16x128xf32>
    %13 = arith.mulf %12, %8 : vector<16x128xf32>
    %cst_6 = arith.constant 4.471500e-02 : f32
    %14 = vector.broadcast %cst_6 : f32 to vector<16x128xf32>
    %15 = arith.mulf %14, %13 : vector<16x128xf32>
    %16 = arith.addf %8, %15 : vector<16x128xf32>
    %17 = vector.broadcast %9 : f32 to vector<16x128xf32>
    %18 = arith.mulf %17, %16 : vector<16x128xf32>
    %19 = math.tanh %18 : vector<16x128xf32>
    %cst_7 = arith.constant 1.000000e+00 : f32
    %20 = vector.broadcast %cst_7 : f32 to vector<16x128xf32>
    %21 = arith.addf %20, %19 : vector<16x128xf32>
    %22 = arith.mulf %11, %21 : vector<16x128xf32>
    %c0_8 = arith.constant 0 : index
    %c0_9 = arith.constant 0 : index
    %23 = vector.load %arg5[%c0_8, %c0_9] : memref<128x32xf32, #tpu.memory_space<vmem>>, vector<128x32xf32>
    %cst_10 = arith.constant dense<0.000000e+00> : vector<16x32xf32>
    %24 = tpu.matmul %22, %23, %cst_10 {dimension_numbers = #tpu.dot_dimension_numbers<[1], [0], [0], [1], [0, 0, 1, 1], [], []>} : vector<16x128xf32>, vector<128x32xf32>, vector<16x32xf32> -> vector<16x32xf32>
    %c0_i32 = arith.constant 0 : i32
    %25 = arith.cmpi eq, %arg1, %c0_i32 : i32
    %26 = arith.extui %25 : i1 to i32
    %c0_i32_11 = arith.constant 0 : i32
    %27 = arith.cmpi ne, %26, %c0_i32_11 : i32
    scf.if %27 {
      %c0_16 = arith.constant 0 : index
      %c0_17 = arith.constant 0 : index
      %34 = vector.load %arg8[%c0_16, %c0_17] : memref<16x32xf32, #tpu.memory_space<vmem>>, vector<16x32xf32>
      tpu.vector_store %arg8[%c0_16, %c0_17], %24 {strides = array<i32>} : memref<16x32xf32, #tpu.memory_space<vmem>>, vector<16x32xf32>,
    } else {
    }
    %c0_i32_12 = arith.constant 0 : i32
    %28 = arith.cmpi sgt, %arg1, %c0_i32_12 : i32
    %29 = arith.extui %28 : i1 to i32
    %c0_i32_13 = arith.constant 0 : i32
    %30 = arith.cmpi ne, %29, %c0_i32_13 : i32
    scf.if %30 {
      %c0_16 = arith.constant 0 : index
      %c0_17 = arith.constant 0 : index
      %34 = vector.load %arg8[%c0_16, %c0_17] : memref<16x32xf32, #tpu.memory_space<vmem>>, vector<16x32xf32>
      %35 = arith.addf %34, %24 : vector<16x32xf32>
      %c0_18 = arith.constant 0 : index
      %c0_19 = arith.constant 0 : index
      %36 = vector.load %arg8[%c0_18, %c0_19] : memref<16x32xf32, #tpu.memory_space<vmem>>, vector<16x32xf32>
      tpu.vector_store %arg8[%c0_18, %c0_19], %35 {strides = array<i32>} : memref<16x32xf32, #tpu.memory_space<vmem>>, vector<16x32xf32>,
    } else {
    }
    %c0_i32_14 = arith.constant 0 : i32
    %31 = arith.cmpi eq, %arg1, %c0_i32_14 : i32
    %32 = arith.extui %31 : i1 to i32
    %c0_i32_15 = arith.constant 0 : i32
    %33 = arith.cmpi ne, %32, %c0_i32_15 : i32
    scf.if %33 {
      %c0_16 = arith.constant 0 : index
      %c0_17 = arith.constant 0 : index
      %34 = vector.load %arg8[%c0_16, %c0_17] : memref<16x32xf32, #tpu.memory_space<vmem>>, vector<16x32xf32>
      %c0_18 = arith.constant 0 : index
      %c0_19 = arith.constant 0 : index
      %35 = vector.load %arg6[%c0_18, %c0_19] : memref<1x32xf32, #tpu.memory_space<vmem>>, vector<1x32xf32>
      %36 = vector.broadcast %35 : vector<1x32xf32> to vector<16x32xf32>
      %37 = arith.addf %34, %36 : vector<16x32xf32>
      %c0_20 = arith.constant 0 : index
      %c0_21 = arith.constant 0 : index
      %38 = vector.load %arg7[%c0_20, %c0_21] : memref<16x32xf32, #tpu.memory_space<vmem>>, vector<16x32xf32>
      tpu.vector_store %arg7[%c0_20, %c0_21], %37 {strides = array<i32>} : memref<16x32xf32, #tpu.memory_space<vmem>>, vector<16x32xf32>,
    } else {
    }
    return
  }
  func.func @transform_0(%arg0: i32, %arg1: i32) -> (i32, i32) {
    %c0_i32 = arith.constant 0 : i32
    %c0_i32_0 = arith.constant 0 : i32
    return %arg0, %c0_i32 : i32, i32
  }
  func.func @transform_1(%arg0: i32, %arg1: i32) -> (i32, i32) {
    %c0_i32 = arith.constant 0 : i32
    %c0_i32_0 = arith.constant 0 : i32
    return %c0_i32, %arg1 : i32, i32
  }
  func.func @transform_2(%arg0: i32, %arg1: i32) -> (i32, i32) {
    %c0_i32 = arith.constant 0 : i32
    %c0_i32_0 = arith.constant 0 : i32
    %c0_i32_1 = arith.constant 0 : i32
    return %c0_i32, %c0_i32_0 : i32, i32
  }
  func.func @transform_3(%arg0: i32, %arg1: i32) -> (i32, i32) {
    %c0_i32 = arith.constant 0 : i32
    %c0_i32_0 = arith.constant 0 : i32
    return %arg1, %c0_i32 : i32, i32
  }
  func.func @transform_4(%arg0: i32, %arg1: i32) -> (i32, i32) {
    %c0_i32 = arith.constant 0 : i32
    %c0_i32_0 = arith.constant 0 : i32
    %c0_i32_1 = arith.constant 0 : i32
    return %c0_i32, %c0_i32_0 : i32, i32
  }
  func.func @transform_5(%arg0: i32, %arg1: i32) -> (i32, i32) {
    %c0_i32 = arith.constant 0 : i32
    %c0_i32_0 = arith.constant 0 : i32
    return %arg0, %c0_i32 : i32, i32
  }
}

</mosaic_0001>

<bundles_post_ra>
// kernel: tpu_custom_call.1
= control target key start
LH: loop header
LB: loop body
LE: loop exit
PB: predicated region body
PF: predicated region fallthrough
CT: control target
= control target key end

     0   :  { %s337_s0 = inlined_call_operand.vmem [shape: f32[16,32], index: 0, kind: input, shape index: {}]   ;;  %s338_s1 = inlined_call_operand.vmem [shape: f32[32,128], index: 1, kind: input, shape index: {}]   ;;  %s339_s2 = inlined_call_operand.vmem [shape: f32[1,128], index: 2, kind: input, shape index: {}]   ;;  %s340_s3 = inlined_call_operand.vmem [shape: f32[128,32], index: 3, kind: input, shape index: {}]   ;;  %s341_s4 = inlined_call_operand.vmem [shape: f32[1,32], index: 4, kind: input, shape index: {}]   ;;  %s342_s5 = inlined_call_operand.hbm [shape: f32[16,32], index: 5, kind: output, shape index: {}]  }
   0x1   :  { %v26_v0 = vld [vmem:[%s338_s1 + $0x18] sm:$0xff]  ;;  %v25_v1 = vld [vmem:[%s338_s1 + $0x10] sm:$0xff]  ;;  %v24_v2 = vld [vmem:[%s338_s1 + $0x8] sm:$0xff] }
   0x2   :  { %54 = vmatpush.msra.mxu0 %v26_v0  ;;  %v98_v3 = vld [vmem:[%s340_s3 + $0x78] sm:$0xff]  ;;  %v97_v4 = vld [vmem:[%s340_s3 + $0x70] sm:$0xff]  ;;  %v23_v5 = vld [vmem:[%s338_s1] sm:$0xff] }
   0x3   :  { %99 = vmatpush.msra.mxu1 %v98_v3  ;;  %v96_v6 = vld [vmem:[%s340_s3 + $0x68] sm:$0xff]  ;;  %172 = vmatpush.msra.mxu2 %v98_v3 }
   0x4   :  { %55 = vmatpush.msra.mxu0 %v25_v1 }
   0x5   :  { %10 = vsyncpa [#allocation4], 0  ;;  %v21_v7 = vld [vmem:[%s337_s0] sm:$0xff]  ;;  %vm35_vm0 = vcmask 261120   ;;  %100 = vmatpush.msra.mxu1 %v97_v4  ;;  %173 = vmatpush.msra.mxu2 %v97_v4  ;;  %v22_v9 = vld [vmem:[%s337_s0 + $0x8] sm:$0xff]  ;;  %s223_s11 = smov [#allocation3]  }
   0x6   :  { %56 = vmatpush.msra.mxu0 %v24_v2  ;;  %v95_v8 = vld [vmem:[%s340_s3 + $0x60] sm:$0xff]  ;;  %v94_v10 = vld [vmem:[%s340_s3 + $0x58] sm:$0xff]  ;;  %v93_v11 = vld [vmem:[%s340_s3 + $0x50] sm:$0xff]  ;;  %s155_s12 = sshll.u32 %s223_s11, 4  ;;  %s157_s15 = sshll.u32 %s342_s5, 4  ;;  %s156_s12 = int_to_ptr.vmem [resolvable:$true] %s155_s12  ;;  %s158_s15 = int_to_ptr.hbm [resolvable:$true] %s157_s15 }
   0x7   :  { %101 = vmatpush.msra.mxu1 %v96_v6  ;;  %174 = vmatpush.msra.mxu2 %v96_v6  ;;  %v92_v12 = vld [vmem:[%s340_s3 + $0x48] sm:$0xff]  ;;  %v91_v13 = vld [vmem:[%s340_s3 + $0x40] sm:$0xff]  ;;  %v90_v14 = vld [vmem:[%s340_s3 + $0x38] sm:$0xff]  ;;  %s225_s16 = smov 8  }
   0x8   :  { %57 = vmatpush.msra.mxu0 %v23_v5  ;;  %v89_v15 = vld [vmem:[%s340_s3 + $0x30] sm:$0xff]  ;;  %v88_v16 = vld [vmem:[%s340_s3 + $0x28] sm:$0xff]  ;;  %v87_v17 = vld [vmem:[%s340_s3 + $0x20] sm:$0xff] }
   0x9   :  { %170 = vmatmul.msk.f32.vlgmr.msra.gmra.mxu0 %vm35_vm0, %v21_v7  ;;  %102 = vmatpush.msra.mxu1 %v95_v8  ;;  %v86_v18 = vld [vmem:[%s340_s3 + $0x18] sm:$0xff]  ;;  %v85_v19 = vld [vmem:[%s340_s3 + $0x10] sm:$0xff]  ;;  %v84_v20 = vld [vmem:[%s340_s3 + $0x8] sm:$0xff] }
   0xa   :  { %175 = vmatpush.msra.mxu2 %v95_v8  ;;  %v83_v21 = vld [vmem:[%s340_s3] sm:$0xff] }
   0xb   :  { %103 = vmatpush.msra.mxu1 %v94_v10  ;;  %v191_v22 = vld [vmem:[%s339_s2] ss:$0 sm:$0xff] }
   0xc   :  { %176 = vmatpush.msra.mxu2 %v94_v10  ;;  %v192_v46 = vld [vmem:[%s341_s4] ss:$0 sm:$0xff]  ;;  %s224_s4 = smov 128  }
   0xd   :  { %104 = vmatpush.msra.mxu1 %v93_v11 }
   0xe   :  { %177 = vmatpush.msra.mxu2 %v93_v11 }
   0xf   :  { %105 = vmatpush.msra.mxu1 %v92_v12 }
  0x10   :  { %178 = vmatpush.msra.mxu2 %v92_v12 }
  0x11   :  { %171 = vmatmul.msk.f32.gmra.mxu0 %vm35_vm0, %v22_v9  ;;  %106 = vmatpush.msra.mxu1 %v91_v13 }
  0x12   :  { %179 = vmatpush.msra.mxu2 %v91_v13 }
  0x13   :  { %107 = vmatpush.msra.mxu1 %v90_v14 }
  0x14   :  { %180 = vmatpush.msra.mxu2 %v90_v14 }
  0x15   :  { %108 = vmatpush.msra.mxu1 %v89_v15 }
  0x16   :  { %181 = vmatpush.msra.mxu2 %v89_v15 }
  0x17   :  { %109 = vmatpush.msra.mxu1 %v88_v16 }
  0x18   :  { %182 = vmatpush.msra.mxu2 %v88_v16 }
  0x19   :  { %110 = vmatpush.msra.mxu1 %v87_v17 }
  0x1a   :  { %183 = vmatpush.msra.mxu2 %v87_v17 }
  0x1b   :  { %111 = vmatpush.msra.mxu1 %v86_v18 }
  0x1c   :  { %184 = vmatpush.msra.mxu2 %v86_v18 }
  0x1d   :  { %112 = vmatpush.msra.mxu1 %v85_v19 }
  0x1e   :  { %185 = vmatpush.msra.mxu2 %v85_v19 }
  0x1f   :  { %113 = vmatpush.msra.mxu1 %v84_v20 }
  0x20   :  { %186 = vmatpush.msra.mxu2 %v84_v20 }
  0x21   :  { %114 = vmatpush.msra.mxu1 %v83_v21 }
  0x22   :  { %187 = vmatpush.msra.mxu2 %v83_v21 }
  0x86   :  { %v59_v23 = vpop.f32.mrf.mxu0 }
  0x87   :  { %v60_v24 = vadd.f32 %v191_v22, %v59_v23 }
  0x89   :  { %v67_v25 = vmul.f32 %v60_v24, %v60_v24  ;;  %v65_v38 = vmul.f32 0.5, %v60_v24 }
  0x8b   :  { %v69_v26 = vmul.f32 %v67_v25, %v60_v24 }
  0x8d   :  { %v71_v27 = vmul.f32 0.044715, %v69_v26 }
  0x8e   :  { %v62_v28 = vpop.f32.mrf.mxu0 }
  0x8f   :  { %v63_v29 = vadd.f32 %v191_v22, %v62_v28  ;;  %v73_v30 = vadd.f32 %v71_v27, %v60_v24 }
  0x91   :  { %v68_v31 = vmul.f32 %v63_v29, %v63_v29  ;;  %v75_v32 = vmul.f32 0.7978845, %v73_v30  ;;  %v66_v42 = vmul.f32 0.5, %v63_v29 }
  0x93   :  { %v70_v33 = vmul.f32 %v68_v31, %v63_v29  ;;  %193 = vtanh.f32 %v75_v32 }
  0x95   :  { %v72_v34 = vmul.f32 0.044715, %v70_v33 }
  0x97   :  { %v74_v35 = vadd.f32 %v72_v34, %v63_v29 }
  0x99   :  { %v194_v36 = vpop.eup %193  ;;  %v76_v37 = vmul.f32 0.7978845, %v74_v35 }
  0x9a   :  { %v79_v39 = vadd.f32 1.0, %v194_v36 }
  0x9b   :  { %195 = vtanh.f32 %v76_v37 }
  0x9c   :  { %v81_v40 = vmul.f32 %v79_v39, %v65_v38 }
  0x9e   :  { %115 = vmatmul.f32.vlgmr.msra.gmra.mxu1 %v81_v40 }
  0xa1   :  { %v196_v41 = vpop.eup %195 }
  0xa2   :  { %v80_v43 = vadd.f32 1.0, %v196_v41 }
  0xa4   :  { %v82_v44 = vmul.f32 %v80_v43, %v66_v42 }
  0xa6   :  { %118 = vmatmul.f32.vlgmr.msra.gmra.mxu2 %v82_v44 }
 0x11b   :  { %v116_v45 = vpop.f32.mrf.mxu1 }
 0x11c   :  { %126 = vst.msk [vmem:[#allocation2] sm:$0xff] %vm35_vm0, %v116_v45 }
 0x123   :  { %v141_v47 = vld [vmem:[#allocation2] sm:$0xff] }
 0x124   :  { %v147_v48 = vadd.f32 %v192_v46, %v141_v47 }
 0x126   :  { %149 = vst.msk [vmem:[#allocation3] sm:$0xff] %vm35_vm0, %v147_v48 }
 0x129   :  { %v119_v49 = vpop.f32.mrf.mxu2 }
 0x12a   :  { %127 = vst.msk [vmem:[#allocation2 + $0x8] sm:$0xff] %vm35_vm0, %v119_v49 }
 0x131   :  { %v142_v50 = vld [vmem:[#allocation2 + $0x8] sm:$0xff] }
 0x132   :  { %v148_v51 = vadd.f32 %v192_v46, %v142_v50 }
 0x134   :  { %150 = vst.msk [vmem:[#allocation3 + $0x8] sm:$0xff] %vm35_vm0, %v148_v51 }
 0x135   :  { %163 = dma.vmem_to_hbm [thread:$0]  %s156_s12, 256, %s158_s15, [#allocation4], %s224_s4, %s224_s4, %s225_s16  }
 0x136   :  { %221 = dma.done.wait [#allocation4], 256  }
 0x137   :  { %222 = vsyncadd [#allocation4], 4294967040 }
 0x138   :  { %168 = vsyncpa [#allocation4], 1 }

</bundles_post_ra>
